<compile_context>
chip_gen: v7x
topology: tpu7x:2x2x1
jax: 0.10.0
libtpu: 0.0.40
codegen_flags: <defaults>
</compile_context>

<pallas_src>
import functools
import math

import jax
import jax.numpy as jnp
from jax import lax
from jax.experimental import pallas as pl
from jax.experimental.pallas import tpu as pltpu


def _round_up(x, m):
    return ((x + m - 1) // m) * m


# ---------------------------------------------------------------------------
# Stage 1: fused K/Q/V projection (runs once over the sequence).
# ---------------------------------------------------------------------------
def _qkv_proj_kernel(x_ref, wq_ref, wk_ref, wv_ref, q_ref, k_ref, v_ref,
                     *, scale):
    """x_ref: (tp, C); w*_ref: (C, H); outputs: (tp, H) in compute_dtype."""
    x = x_ref[...]
    q = jnp.dot(x, wq_ref[...], preferred_element_type=jnp.float32)
    # Fold 1/sqrt(head_size) into q: O(T*H) multiplies instead of O(T*T).
    q_ref[...] = (q * scale).astype(q_ref.dtype)
    k_ref[...] = jnp.dot(x, wk_ref[...],
                         preferred_element_type=jnp.float32).astype(k_ref.dtype)
    v_ref[...] = jnp.dot(x, wv_ref[...],
                         preferred_element_type=jnp.float32).astype(v_ref.dtype)


# ---------------------------------------------------------------------------
# Stage 2: flash-attention over the pre-projected q/k/v.
# ---------------------------------------------------------------------------
def _attn_kernel(q_ref, k_ref, v_ref, o_ref, m_scr, l_scr, acc_scr,
                 *, block_q, block_k, approx_recip):
    """Refs (batch dim squeezed by BlockSpec):
      q_ref : (block_q, H)  pre-scaled query tile (resident across the j loop)
      k_ref : (block_k, H)  key tile
      v_ref : (block_k, H)  value tile
      o_ref : (block_q, H)  output tile (written at the last kv step)
    """
    i = pl.program_id(1)            # query-tile index
    j = pl.program_id(2)            # kv-tile index (innermost, reduction)

    @pl.when(j == 0)
    def _init():
        m_scr[...] = jnp.full_like(m_scr, -jnp.inf)
        l_scr[...] = jnp.zeros_like(l_scr)
        acc_scr[...] = jnp.zeros_like(acc_scr)

    first_q = i * block_q
    last_q = first_q + (block_q - 1)
    first_k = j * block_k
    last_k = first_k + (block_k - 1)
    should_compute = first_k <= last_q     # tile has at least one unmasked key
    needs_mask = last_k > first_q          # tile straddles the causal diagonal

    def body(apply_mask):
        # q @ k^T with the transpose folded into the MXU contraction
        # (contract the last dims of both operands; no materialized k.T).
        s = lax.dot_general(
            q_ref[...], k_ref[...],
            dimension_numbers=(((1,), (1,)), ((), ())),
            preferred_element_type=jnp.float32)                    # (bq, bk)

        if apply_mask:
            # Causal mask in global coordinates. Padded key rows live at
            # col >= T > any real query row, so they are masked automatically.
            row = first_q + lax.broadcasted_iota(jnp.int32, s.shape, 0)
            col = first_k + lax.broadcasted_iota(jnp.int32, s.shape, 1)
            s = jnp.where(col <= row, s, -jnp.inf)

        # Online (flash) softmax update; elementwise math stays f32.
        m_prev = m_scr[...]
        m_new = jnp.maximum(m_prev, jnp.max(s, axis=-1, keepdims=True))
        alpha = jnp.exp(m_prev - m_new)
        p = jnp.exp(s - m_new)
        l_scr[...] = alpha * l_scr[...] + jnp.sum(p, axis=-1, keepdims=True)
        acc_scr[...] = alpha * acc_scr[...] + jnp.dot(
            p.astype(v_ref.dtype), v_ref[...],
            preferred_element_type=jnp.float32)
        m_scr[...] = m_new

    # Mask work (iota + cmp + select) only on diagonal-straddling tiles;
    # fully-below-diagonal tiles take the mask-free path.
    @pl.when(jnp.logical_and(should_compute, needs_mask))
    def _diag_tile():
        body(apply_mask=True)

    @pl.when(jnp.logical_and(should_compute, jnp.logical_not(needs_mask)))
    def _full_tile():
        body(apply_mask=False)

    # (dropout on the attention weights is eval-mode identity here)

    @pl.when(j == pl.num_programs(2) - 1)
    def _finalize():
        inv_l = pl.reciprocal(l_scr[...], approx=approx_recip)
        o_ref[...] = (acc_scr[...] * inv_l).astype(o_ref.dtype)


def head_forward(x, w_key, w_query, w_value, *, head_size,
                 block_q=256, block_k=256,
                 compute_dtype=jnp.bfloat16):
    """x: (B, T, C); w_*: (C, head_size) (pre-transposed vs. nn.Linear).

    Returns (B, T, head_size) float32. Matmul operands are stored/streamed in
    `compute_dtype` (bf16 by default) with f32 accumulation; pass
    compute_dtype=jnp.float32 for full-precision matmuls.
    Defaults (256, 256) are safe on all generations; sweep larger tiles
    (e.g. 512) on v6e where VMEM is plentiful and per-step overhead binds.
    """
    B, T, C = x.shape
    H = head_size
    assert block_q % 8 == 0 and block_k % 8 == 0
    cd = jnp.dtype(compute_dtype)

    tq = min(block_q, _round_up(T, 8))
    tk = min(block_k, _round_up(T, 8))
    # Keep lcm(tq, tk) == max(tq, tk) so sequence padding stays under one tile.
    if (tq % tk) and (tk % tq):
        tk = tq
    T_pad = _round_up(T, max(tq, tk))
    nq, nk = T_pad // tq, T_pad // tk
    tp = min(tq, tk)                # projection row tile (divides T_pad)
    n_rows = T_pad // tp

    # Pre-cast to compute_dtype in the wrapper (halves HBM<->VMEM DMA bytes
    # and removes per-grid-step VPU casts).  No channel/head padding: block
    # last dims use the full C / H extents, so a small head is not blown up
    # to 128 lanes.  Zero padding along T is sliced off below (padded keys
    # are causally masked for all real queries).
    x_p = jnp.pad(x, ((0, 0), (0, T_pad - T), (0, 0))).astype(cd)
    wq_c = w_query.astype(cd)
    wk_c = w_key.astype(cd)
    wv_c = w_value.astype(cd)

    scale = float(head_size) ** -0.5

    # ---------------- Stage 1: Q/K/V projection ----------------
    # Weight blocks have a constant index_map, so they are fetched once and
    # stay resident across the grid.  (A further knob: single-buffer them via
    # pipeline_mode=pl.Buffered(1) when C is large.)
    q_p, k_p, v_p = pl.pallas_call(
        functools.partial(_qkv_proj_kernel, scale=scale),
        out_shape=tuple(jax.ShapeDtypeStruct((B, T_pad, H), cd)
                        for _ in range(3)),
        grid_spec=pltpu.PrefetchScalarGridSpec(
            num_scalar_prefetch=0,
            grid=(B, n_rows),
            in_specs=[
                pl.BlockSpec((pl.Squeezed(), tp, C), lambda b, r: (b, r, 0)),
                pl.BlockSpec((C, H), lambda b, r: (0, 0)),
                pl.BlockSpec((C, H), lambda b, r: (0, 0)),
                pl.BlockSpec((C, H), lambda b, r: (0, 0)),
            ],
            out_specs=[
                pl.BlockSpec((pl.Squeezed(), tp, H), lambda b, r: (b, r, 0)),
                pl.BlockSpec((pl.Squeezed(), tp, H), lambda b, r: (b, r, 0)),
                pl.BlockSpec((pl.Squeezed(), tp, H), lambda b, r: (b, r, 0)),
            ],
        ),
        compiler_params=pltpu.CompilerParams(
            dimension_semantics=("parallel", "parallel")),
    )(x_p, wq_c, wk_c, wv_c)

    # ---------------- Stage 2: flash attention ----------------
    # Last kv block holding any unmasked key for query tile i; clamping the
    # k/v index_maps to it suppresses DMA of tiles above the diagonal.
    def last_kv(i):
        return (i * tq + tq - 1) // tk

    # VMEM budget derived from the actual double-buffered tiles (+ headroom),
    # capped well under v7x's 64 MiB physical VMEM.
    attn_bytes = (2 * (tq + 2 * tk) * H * cd.itemsize   # q/k/v double buffers
                  + 2 * tq * H * 4                      # output double buffer
                  + (2 * tq + tq * H) * 4)              # m/l/acc scratch
    vmem_limit = int(min(40 * 1024 * 1024,
                         max(16 * 1024 * 1024, 4 * attn_bytes)))

    kernel = functools.partial(
        _attn_kernel, block_q=tq, block_k=tk,
        approx_recip=bool(cd != jnp.float32))

    out_p = pl.pallas_call(
        kernel,
        out_shape=jax.ShapeDtypeStruct((B, T_pad, H), jnp.float32),
        grid_spec=pltpu.PrefetchScalarGridSpec(
            num_scalar_prefetch=0,
            grid=(B, nq, nk),
            in_specs=[
                # q tile: constant over the kv axis -> fetched once per (b, i).
                pl.BlockSpec((pl.Squeezed(), tq, H),
                             lambda b, i, j: (b, i, 0)),
                # k/v tiles: index clamped so causally-dead tiles are not DMA'd.
                pl.BlockSpec((pl.Squeezed(), tk, H),
                             lambda b, i, j: (b, jnp.minimum(j, last_kv(i)), 0)),
                pl.BlockSpec((pl.Squeezed(), tk, H),
                             lambda b, i, j: (b, jnp.minimum(j, last_kv(i)), 0)),
            ],
            out_specs=pl.BlockSpec((pl.Squeezed(), tq, H),
                                   lambda b, i, j: (b, i, 0)),
            scratch_shapes=[
                pltpu.VMEM((tq, 1), jnp.float32),    # running max m
                pltpu.VMEM((tq, 1), jnp.float32),    # running denom l
                pltpu.VMEM((tq, H), jnp.float32),    # output accumulator
            ],
        ),
        compiler_params=pltpu.CompilerParams(
            # On v7x (2 TCs) the two parallel axes give B*nq units of work.
            dimension_semantics=("parallel", "parallel", "arbitrary"),
            vmem_limit_bytes=vmem_limit,
        ),
    )(q_p, k_p, v_p)

    return out_p[:, :T, :]


def head_reference(x, w_key, w_query, w_value, *, head_size):
    """Plain-JAX reference mirroring the PyTorch module (eval mode)."""
    B, T, C = x.shape
    k = x @ w_key
    q = x @ w_query
    v = x @ w_value
    wei = jnp.einsum("btd,bsd->bts", q, k) * (head_size ** -0.5)
    mask = jnp.tril(jnp.ones((T, T), dtype=bool))
    wei = jnp.where(mask, wei, -jnp.inf)
    wei = jax.nn.softmax(wei, axis=-1)
    return wei @ v


if __name__ == "__main__":
    # Small deterministic example consistent with the module:
    #   block_size = T = 8, n_embd = C = 32, head_size = 16, batch = 2.
    B, T, C, H = 2, 8, 32, 16

    key = jax.random.PRNGKey(0)
    kx, kk, kq, kv = jax.random.split(key, 4)

    x = jax.random.normal(kx, (B, T, C), dtype=jnp.float32)
    # Deterministic "parameters" (analogous to nn.Linear weights, stored
    # pre-transposed as (C, H)).
    w_key = jax.random.normal(kk, (C, H), dtype=jnp.float32) * (C ** -0.5)
    w_query = jax.random.normal(kq, (C, H), dtype=jnp.float32) * (C ** -0.5)
    w_value = jax.random.normal(kv, (C, H), dtype=jnp.float32) * (C ** -0.5)

    # Default (bf16-stream) path; tolerance accounts for bf16 operands.
    out = head_forward(x, w_key, w_query, w_value, head_size=H)
    out = jax.block_until_ready(out)
    ref = head_reference(x, w_key, w_query, w_value, head_size=H)
    assert out.shape == (B, T, H)
    assert jnp.allclose(out, ref, atol=1e-1, rtol=1e-1), "bf16 path mismatch"

    # Multi-tile check (exercises the KV-tiled online softmax, the diagonal /
    # below-diagonal mask branches, the causal DMA clamp and accumulator
    # carry) with f32 matmuls + exact reciprocal for a tighter bound.
    T2 = 32
    x2 = jax.random.normal(jax.random.PRNGKey(1), (B, T2, C), dtype=jnp.float32)
    out2 = head_forward(x2, w_key, w_query, w_value, head_size=H,
                        block_q=16, block_k=16, compute_dtype=jnp.float32)
    out2 = jax.block_until_ready(out2)
    ref2 = head_reference(x2, w_key, w_query, w_value, head_size=H)
    assert out2.shape == (B, T2, H)
    assert jnp.allclose(out2, ref2, atol=2e-2, rtol=2e-2), "tiled path mismatch"

    print("KERNEL_OK")
</pallas_src>

<mosaic_0001>
module attributes {stable_mosaic.version = 11 : i64} {
  func.func @_qkv_proj_kernel(%arg0: i32, %arg1: i32, %arg2: memref<1x8x32xbf16, #tpu.memory_space<vmem>>, %arg3: memref<32x16xbf16, #tpu.memory_space<vmem>>, %arg4: memref<32x16xbf16, #tpu.memory_space<vmem>>, %arg5: memref<32x16xbf16, #tpu.memory_space<vmem>>, %arg6: memref<1x8x16xbf16, #tpu.memory_space<vmem>>, %arg7: memref<1x8x16xbf16, #tpu.memory_space<vmem>>, %arg8: memref<1x8x16xbf16, #tpu.memory_space<vmem>>) attributes {dimension_semantics = [#tpu.dimension_semantics<parallel>, #tpu.dimension_semantics<parallel>], iteration_bounds = array<i64: 2, 1>, scalar_prefetch = 0 : i64, scratch_operands = 0 : i64, tpu.core_type = #tpu.core_type<tc>, window_params = [{transform_indices = @transform_0, window_bounds = array<i64: 1, 8, 32>}, {pipeline_mode = #tpu.pipeline_mode<synchronous>, transform_indices = @transform_1, window_bounds = array<i64: 32, 16>}, {pipeline_mode = #tpu.pipeline_mode<synchronous>, transform_indices = @transform_2, window_bounds = array<i64: 32, 16>}, {pipeline_mode = #tpu.pipeline_mode<synchronous>, transform_indices = @transform_3, window_bounds = array<i64: 32, 16>}, {transform_indices = @transform_4, window_bounds = array<i64: 1, 8, 16>}, {transform_indices = @transform_5, window_bounds = array<i64: 1, 8, 16>}, {transform_indices = @transform_6, window_bounds = array<i64: 1, 8, 16>}]} {
    %c0 = arith.constant 0 : index
    %c0_0 = arith.constant 0 : index
    %c0_1 = arith.constant 0 : index
    %0 = vector.load %arg2[%c0, %c0_0, %c0_1] : memref<1x8x32xbf16, #tpu.memory_space<vmem>>, vector<1x8x32xbf16>
    %1 = vector.shape_cast %0 : vector<1x8x32xbf16> to vector<8x32xbf16>
    %c0_2 = arith.constant 0 : index
    %c0_3 = arith.constant 0 : index
    %2 = vector.load %arg3[%c0_2, %c0_3] : memref<32x16xbf16, #tpu.memory_space<vmem>>, vector<32x16xbf16>
    %cst = arith.constant dense<0.000000e+00> : vector<8x16xf32>
    %3 = tpu.matmul %1, %2, %cst {dimension_numbers = #tpu.dot_dimension_numbers<[1], [0], [0], [1], [0, 0, 1, 1], [], []>} : vector<8x32xbf16>, vector<32x16xbf16>, vector<8x16xf32> -> vector<8x16xf32>
    %cst_4 = arith.constant 2.500000e-01 : f32
    %4 = vector.broadcast %cst_4 : f32 to vector<8x16xf32>
    %5 = arith.mulf %3, %4 : vector<8x16xf32>
    %6 = arith.truncf %5 : vector<8x16xf32> to vector<8x16xbf16>
    %c0_5 = arith.constant 0 : index
    %c0_6 = arith.constant 0 : index
    %c0_7 = arith.constant 0 : index
    %7 = vector.load %arg6[%c0_5, %c0_6, %c0_7] : memref<1x8x16xbf16, #tpu.memory_space<vmem>>, vector<1x8x16xbf16>
    %8 = vector.shape_cast %7 : vector<1x8x16xbf16> to vector<8x16xbf16>
    %9 = vector.shape_cast %6 : vector<8x16xbf16> to vector<1x8x16xbf16>
    tpu.vector_store %arg6[%c0_5, %c0_6, %c0_7], %9 {strides = array<i32>} : memref<1x8x16xbf16, #tpu.memory_space<vmem>>, vector<1x8x16xbf16>,
    %c0_8 = arith.constant 0 : index
    %c0_9 = arith.constant 0 : index
    %10 = vector.load %arg4[%c0_8, %c0_9] : memref<32x16xbf16, #tpu.memory_space<vmem>>, vector<32x16xbf16>
    %cst_10 = arith.constant dense<0.000000e+00> : vector<8x16xf32>
    %11 = tpu.matmul %1, %10, %cst_10 {dimension_numbers = #tpu.dot_dimension_numbers<[1], [0], [0], [1], [0, 0, 1, 1], [], []>} : vector<8x32xbf16>, vector<32x16xbf16>, vector<8x16xf32> -> vector<8x16xf32>
    %12 = arith.truncf %11 : vector<8x16xf32> to vector<8x16xbf16>
    %c0_11 = arith.constant 0 : index
    %c0_12 = arith.constant 0 : index
    %c0_13 = arith.constant 0 : index
    %13 = vector.load %arg7[%c0_11, %c0_12, %c0_13] : memref<1x8x16xbf16, #tpu.memory_space<vmem>>, vector<1x8x16xbf16>
    %14 = vector.shape_cast %13 : vector<1x8x16xbf16> to vector<8x16xbf16>
    %15 = vector.shape_cast %12 : vector<8x16xbf16> to vector<1x8x16xbf16>
    tpu.vector_store %arg7[%c0_11, %c0_12, %c0_13], %15 {strides = array<i32>} : memref<1x8x16xbf16, #tpu.memory_space<vmem>>, vector<1x8x16xbf16>,
    %c0_14 = arith.constant 0 : index
    %c0_15 = arith.constant 0 : index
    %16 = vector.load %arg5[%c0_14, %c0_15] : memref<32x16xbf16, #tpu.memory_space<vmem>>, vector<32x16xbf16>
    %cst_16 = arith.constant dense<0.000000e+00> : vector<8x16xf32>
    %17 = tpu.matmul %1, %16, %cst_16 {dimension_numbers = #tpu.dot_dimension_numbers<[1], [0], [0], [1], [0, 0, 1, 1], [], []>} : vector<8x32xbf16>, vector<32x16xbf16>, vector<8x16xf32> -> vector<8x16xf32>
    %18 = arith.truncf %17 : vector<8x16xf32> to vector<8x16xbf16>
    %c0_17 = arith.constant 0 : index
    %c0_18 = arith.constant 0 : index
    %c0_19 = arith.constant 0 : index
    %19 = vector.load %arg8[%c0_17, %c0_18, %c0_19] : memref<1x8x16xbf16, #tpu.memory_space<vmem>>, vector<1x8x16xbf16>
    %20 = vector.shape_cast %19 : vector<1x8x16xbf16> to vector<8x16xbf16>
    %21 = vector.shape_cast %18 : vector<8x16xbf16> to vector<1x8x16xbf16>
    tpu.vector_store %arg8[%c0_17, %c0_18, %c0_19], %21 {strides = array<i32>} : memref<1x8x16xbf16, #tpu.memory_space<vmem>>, vector<1x8x16xbf16>,
    return
  }
  func.func @transform_0(%arg0: i32, %arg1: i32) -> (i32, i32, i32) {
    %c0_i32 = arith.constant 0 : i32
    %c0_i32_0 = arith.constant 0 : i32
    return %arg0, %arg1, %c0_i32 : i32, i32, i32
  }
  func.func @transform_1(%arg0: i32, %arg1: i32) -> (i32, i32) {
    %c0_i32 = arith.constant 0 : i32
    %c0_i32_0 = arith.constant 0 : i32
    %c0_i32_1 = arith.constant 0 : i32
    return %c0_i32, %c0_i32_0 : i32, i32
  }
  func.func @transform_2(%arg0: i32, %arg1: i32) -> (i32, i32) {
    %c0_i32 = arith.constant 0 : i32
    %c0_i32_0 = arith.constant 0 : i32
    %c0_i32_1 = arith.constant 0 : i32
    return %c0_i32, %c0_i32_0 : i32, i32
  }
  func.func @transform_3(%arg0: i32, %arg1: i32) -> (i32, i32) {
    %c0_i32 = arith.constant 0 : i32
    %c0_i32_0 = arith.constant 0 : i32
    %c0_i32_1 = arith.constant 0 : i32
    return %c0_i32, %c0_i32_0 : i32, i32
  }
  func.func @transform_4(%arg0: i32, %arg1: i32) -> (i32, i32, i32) {
    %c0_i32 = arith.constant 0 : i32
    %c0_i32_0 = arith.constant 0 : i32
    return %arg0, %arg1, %c0_i32 : i32, i32, i32
  }
  func.func @transform_5(%arg0: i32, %arg1: i32) -> (i32, i32, i32) {
    %c0_i32 = arith.constant 0 : i32
    %c0_i32_0 = arith.constant 0 : i32
    return %arg0, %arg1, %c0_i32 : i32, i32, i32
  }
  func.func @transform_6(%arg0: i32, %arg1: i32) -> (i32, i32, i32) {
    %c0_i32 = arith.constant 0 : i32
    %c0_i32_0 = arith.constant 0 : i32
    return %arg0, %arg1, %c0_i32 : i32, i32, i32
  }
}

</mosaic_0001>

<bundles_post_ra>
// kernel: tpu_custom_call.1
= control target key start
LH: loop header
LB: loop body
LE: loop exit
PB: predicated region body
PF: predicated region fallthrough
CT: control target
= control target key end

     0   :  { %s1203_s0 = inlined_call_operand.vmem [shape: bf16[2,8,32], index: 0, kind: input, shape index: {}]   ;;  %s1204_s1 = inlined_call_operand.vmem [shape: bf16[32,16], index: 1, kind: input, shape index: {}]   ;;  %s1205_s2 = inlined_call_operand.vmem [shape: bf16[32,16], index: 2, kind: input, shape index: {}]   ;;  %s1206_s3 = inlined_call_operand.vmem [shape: bf16[32,16], index: 3, kind: input, shape index: {}]   ;;  %s1207_s4 = inlined_call_operand.hbm [shape: bf16[2,8,16], index: 4, kind: output, shape index: {0}]   ;;  %s1208_s5 = inlined_call_operand.hbm [shape: bf16[2,8,16], index: 5, kind: output, shape index: {1}]   ;;  %s1209_s6 = inlined_call_operand.hbm [shape: bf16[2,8,16], index: 6, kind: output, shape index: {2}]  }
   0x1   :  { %1213 = sst [smem:[#allocation9_spill]] %s1203_s0 }
   0x2   :  { %12 = vsyncpa [#allocation3], 0 }
   0x3   :  { %14 = vsyncpa [#allocation3 + $0x1], 0 }
   0x4   :  { %15 = vsyncpa [#allocation5], 0 }
   0x5   :  { %17 = vsyncpa [#allocation5 + $0x1], 0  ;;  %s975_s21 = smov 0   ;;  %s977_s22 = smov 0  }
   0x6   :  { %s979_s23 = smov 0   ;;  %s981_s24 = smov 0  }
   0x7   :  { %s983_s25 = smov 0   ;;  %s985_s26 = smov 0  }
   0x8 LB: > { %s663_s27 = sadd.s32 4294967295, %s933_s26   ;;  %s1210_s28 = sadd.s32 4294967294, %s933_s26   ;;  %s933_s26 = sphi %s985_s26, %s23_s26   ;;  %s929_s25 = sphi %s983_s25, %s1226_s25   ;;  %s925_s24 = sphi %s981_s24, %s1225_s24   ;;  %s921_s23 = sphi %s979_s23, %s1224_s23   ;;  %s917_s22 = sphi %s977_s22, %s1223_s22   ;;  %s913_s21 = sphi %s975_s21, %s1222_s21  }
   0x9   : > { %s35_s29 = sadd.s32 1, %s929_s25  ;;  %s135_s30 = sadd.s32 1, %s921_s23 }
   0xa   : > { %p37_p0 = scmp.ge.s32.totalorder %s35_s29, 2  ;;  %p145_p1 = scmp.ne.s32.totalorder %s921_s23, %s917_s22 }
   0xb   : > { %p146_p2 = scmp.eq.s32.totalorder %s663_s27, 1  ;;  %p151_p3 = scmp.ne.s32.totalorder %s917_s22, %s913_s21 }
   0xc   : > { %s1228_s29 = smov (%p37_p0, %s35_s29), 0  ;;  %p152_p5 = scmp.eq.s32.totalorder %s1210_s28, 1 }
   0xd   : > { %p1017_p4 = por %p146_p2, %p145_p1  ;;  %s130_s8 = ssub.s32 %s929_s25, %s1228_s29 }
   0xe   : > { %p667_p6 = scmp.ge.s32.totalorder %s933_s26, 1  ;;  %p133_p7 = scmp.eq.s32.totalorder %s130_s8, 0 }
   0xf   : > { %p1026_p8 = por %p152_p5, %p151_p3  ;;  %p245_p9 = scmp.lt.s32.totalorder %s933_s26, 3 }
  0x10   : > { %s1032_s10 = scalar_select %p133_p7, %s921_s23, %s135_s30  }
  0x11   : > { %p246_p10 = pnand %p667_p6, %p245_p9 }
  0x12   : > { %v789_v0 = vld [vmem:[%s1204_s1] sm:$0xff] (!%p246_p10)   ;;  %v935_v1 = vmov (!%p246_p10), 0.0   ;;  %v790_v2 = vld [vmem:[%s1204_s1 + $0x8] sm:$0xff] (!%p246_p10)   ;;  %vm936_vm0 = vmmov (!%p246_p10), 0   ;;  %p287_p11 = scmp.lt.s32.totalorder (!%p246_p10), %s925_s24, 1  ;;  %vm312_vm1 = vcmask (!%p246_p10), 261120  }
  0x13   : > { %249 = sbr.rel (%p246_p10) target bundleno = 309 (0x135), region = 36  ;;  %698 = vmatprep.subr.bf16.mxu0 (!%p246_p10), %v935_v1  ;;  %706 = vmatprep.subr.bf16.mxu1 (!%p246_p10), %v935_v1  ;;  %v791_v3 = vld [vmem:[%s1205_s2] sm:$0xff] (!%p246_p10)   ;;  %v793_v4 = vld [vmem:[%s1205_s2 + $0x8] sm:$0xff] (!%p246_p10)   ;;  %s1216_s0 = sld [smem:[#allocation9_spill]] (!%p246_p10)  ;;  %vm358_vm2 = vcmask (!%p246_p10), 125952  }
  0x14   : > { %699 = vmatpush3.bf16.msra.mxu0 (!%p246_p10), %v789_v0  ;;  %702 = vmatprep.mubr.msk.bf16.mxu0 (!%p246_p10), %vm936_vm0, %v935_v1  ;;  %v792_v5 = vld [vmem:[%s1206_s3] sm:$0xff] (!%p246_p10)   ;;  %v794_v7 = vld [vmem:[%s1206_s3 + $0x8] sm:$0xff] (!%p246_p10)   ;;  %s1211_s16 = sand.u32 (!%p246_p10), 1, %s917_s22   ;;  %s1067_s18 = sand.u32 (!%p246_p10), 1, %s663_s27  }
  0x15   : > { %700 = vmatprep.subr.bf16.mxu0 (!%p246_p10), %v935_v1  ;;  %710 = vmatprep.mubr.msk.bf16.mxu1 (!%p246_p10), %vm936_vm0, %v935_v1  ;;  %s1070_s19 = sshll.u32 (!%p246_p10), %s925_s24, 6 }
  0x16   : > { %707 = vmatpush3.bf16.msra.mxu1 (!%p246_p10), %v791_v3  ;;  %s1086_s15 = scalar_lea.hbm (!%p246_p10), %s1207_s4, %s1070_s19 }
  0x17   : > { %708 = vmatprep.subr.bf16.mxu1 (!%p246_p10), %v935_v1 }
  0x18   : > { %701 = vmatpush3.bf16.msra.mxu0 (!%p246_p10), %v790_v2 }
  0x19   : > { %714 = vmatprep.subr.bf16.mxu0 (!%p246_p10), %v935_v1 }
  0x1a   : > { %s288_s17 = scalar_select %p287_p11, %s925_s24, 1  ;;  %709 = vmatpush3.bf16.msra.mxu1 %v793_v4 }
  0x1b   : > { %s1078_s24 = scalar_lea.hbm %s1208_s5, %s1070_s19 }
  0x1c   : > { %s671_s20 = sshll.u32 %s288_s17, 2  ;;  %s1063_s17 = sshll.u32 %s1211_s16, 2 }
  0x1d   : > { %s293_s13 = scalar_lea.vmem %s1216_s0, %s671_s20  ;;  %s279_s20 = scalar_lea.vmem [#allocation4], %s1063_s17 }
  0x1e   : > { %v295_v6 = vld [vmem:[%s293_s13] sm:$0xf]  ;;  %s515_s30 = sshll.u32 %s279_s20, 4  ;;  %s272_s8 = scalar_lea.vmem [#allocation2], %s1063_s17  ;;  %s1080_s30 = int_to_ptr.vmem [resolvable:$true] %s515_s30 }
  0x1f   : > { %703 = vmatmul.mubr.msk.bf16.vlgmr.msra.gmra.mrb[0].mxu0 %vm312_vm1, %v295_v6  ;;  %711 = vmatmul.mubr.msk.bf16.vlgmr.msra.gmra.mrb[0].mxu1 %vm312_vm1, %v295_v6  ;;  %s501_s11 = sshll.u32 %s272_s8, 4  ;;  %s1212_s12 = scalar_lea.vmem [#allocation6], %s1063_s17  ;;  %s1088_s11 = int_to_ptr.vmem [resolvable:$true] %s501_s11 }
  0x20   : > { %715 = vmatpush3.bf16.msra.mxu0 %v792_v5  ;;  %718 = vmatprep.mubr.msk.bf16.mxu0 %vm936_vm0, %v935_v1  ;;  %s1095_s27 = sshll.u32 %s1212_s12, 4  ;;  %s795_s16 = scalar_lea.vmem %s1080_s30, 64  ;;  %s1151_s27 = int_to_ptr.vmem [resolvable:$true] %s1095_s27 }
  0x21   : > { %716 = vmatprep.subr.bf16.mxu0 %v935_v1  ;;  %p796_p12 = scmp.ne.s32.totalorder %s1080_s30, %s795_s16  ;;  %s937_s13 = smov [#allocation4]  }
  0x22   : > { %s799_s14 = sshll.u32 %s937_s13, 4  ;;  %s800_s14 = int_to_ptr.vmem [resolvable:$false] %s799_s14 }
  0x23   : > { %p797_p13 = pnand %p796_p12, %p1017_p4  ;;  %s801_s0 = scalar_lea.vmem %s800_s14, 128 }
  0x24   : > { %717 = vmatpush3.bf16.msra.mxu0 %v794_v7  ;;  %p802_p1 = scmp.lt.s32.totalorder %s1080_s30, %s800_s14  ;;  %p803_p2 = scmp.lt.s32.totalorder %s801_s0, %s795_s16 }
  0x25   : > { %p798_p0 = pneg %p797_p13 }
  0x26   : > { %p804_p3 = por %p803_p2, %p802_p1 }
  0x27   : > { %719 = vmatmul.mubr.msk.bf16.vlgmr.msra.gmra.mrb[4].mxu0 %vm312_vm1, %v295_v6 }
  0x28   : > { %p805_p5 = pnand %p804_p3, %p798_p0 }
  0xf2   : > { %v350_v8 = vpop.f32.mrb[0].mxu0  ;;  %v410_v12 = vpop.f32.mrb[0].mxu1 }
  0xf3   : > { %v356_v9 = vmul.f32 0.25, %v350_v8  ;;  %v704_v10 = vpop.f32.mrb[1].mxu0  ;;  %v416_v15 = vpack.c.bf16 %v410_v12, %v410_v12  ;;  %v712_v16 = vpop.f32.mrb[1].mxu1 }
  0xf4   : > { %v353_v11 = vpop.f32.mrb[2].mxu0  ;;  %v413_v17 = vpop.f32.mrb[2].mxu1 }
  0xf5   : > { %v357_v13 = vpack.c.bf16 %v356_v9, %v356_v9  ;;  %v705_v14 = vpop.f32.mrb[3].mxu0  ;;  %v713_v18 = vpop.f32.mrb[3].mxu1  ;;  %417 = vst.msk [vmem:[%s279_s20] sm:$0xf] %vm358_vm2, %v416_v15 }
  0xf7   : > { %359 = vst.msk [vmem:[%s272_s8] sm:$0xf] %vm358_vm2, %v357_v13 }
  0xf8   : > { %808 = shalt.err (!%p805_p5)
}
  0xf9   : > { %s809_s20 = scalar_lea.hbm %s1078_s24, 64  ;;  %s813_s13 = scalar_lea.hbm %s1208_s5, 128 }
  0xfa   : > { %p810_p6 = scmp.ne.s32.totalorder %s1078_s24, %s809_s20  ;;  %p814_p10 = scmp.lt.u32.totalorder %s1078_s24, %s1208_s5 }
  0xfb   : > { %p815_p11 = scmp.lt.u32.totalorder %s813_s13, %s809_s20  ;;  %p817_p13 = scmp.lt.u32.totalorder %s809_s20, %s1078_s24 }
  0xfc   : > { %p811_p7 = pnand %p810_p6, %p1017_p4 }
  0xfd   : > { %p816_p12 = por %p815_p11, %p814_p10 }
  0xfe   : > { %p812_p9 = pneg %p811_p7 }
  0xff   : > { %p818_p0 = por %p817_p13, %p816_p12 }
 0x101   : > { %p819_p1 = pnand %p818_p0, %p812_p9 }
 0x103   : > { %822 = shalt.err (!%p819_p1)
}
 0x104   : > { %s1217_s0 = scalar_lea.sflag [#allocation5], %s1067_s18  ;;  %s1218_s28 = sand.u32 1, %s917_s22  }
 0x105   : > { %723 = dma.vmem_to_hbm [thread:$0]  (%p1017_p4), %s1080_s30, 64, %s1078_s24, %s1217_s0  }
 0x106   : > { %s477_s16 = scalar_lea.sflag [#allocation3], %s1218_s28  ;;  %s823_s12 = scalar_lea.vmem %s1088_s11, 64 }
 0x107   : > { %p824_p2 = scmp.ne.s32.totalorder %s1088_s11, %s823_s12  ;;  %s938_s20 = smov [#allocation2]  }
 0x108   : > { %s827_s8 = sshll.u32 %s938_s20, 4  ;;  %s828_s8 = int_to_ptr.vmem [resolvable:$false] %s827_s8 }
 0x109   : > { %p825_p3 = pnand %p824_p2, %p1017_p4  ;;  %s829_s13 = scalar_lea.vmem %s828_s8, 128 }
 0x10a   : > { %p830_p6 = scmp.lt.s32.totalorder %s1088_s11, %s828_s8  ;;  %p831_p7 = scmp.lt.s32.totalorder %s829_s13, %s823_s12 }
 0x10b   : > { %p826_p5 = pneg %p825_p3 }
 0x10c   : > { %p832_p9 = por %p831_p7, %p830_p6 }
 0x10e   : > { %p833_p10 = pnand %p832_p9, %p826_p5 }
 0x110   : > { %836 = shalt.err (!%p833_p10)
}
 0x111   : > { %s837_s30 = scalar_lea.hbm %s1086_s15, 64  ;;  %s841_s0 = scalar_lea.hbm %s1207_s4, 128 }
 0x112   : > { %p838_p11 = scmp.ne.s32.totalorder %s1086_s15, %s837_s30  ;;  %p842_p0 = scmp.lt.u32.totalorder %s1086_s15, %s1207_s4 }
 0x113   : > { %p843_p1 = scmp.lt.u32.totalorder %s841_s0, %s837_s30  ;;  %p845_p3 = scmp.lt.u32.totalorder %s837_s30, %s1086_s15 }
 0x114   : > { %p839_p12 = pnand %p838_p11, %p1017_p4 }
 0x115   : > { %p844_p2 = por %p843_p1, %p842_p0 }
 0x116   : > { %p840_p13 = pneg %p839_p12 }
 0x117   : > { %p846_p5 = por %p845_p3, %p844_p2 }
 0x119   : > { %p847_p6 = pnand %p846_p5, %p840_p13 }
 0x11b   : > { %850 = shalt.err (!%p847_p6)
}
 0x11c   : > { %722 = dma.vmem_to_hbm [thread:$0]  (%p1017_p4), %s1088_s11, 64, %s1086_s15, %s477_s16   ;;  %v468_v19 = vpop.f32.mrb[4].mxu0 }
 0x11d   : > { %v474_v20 = vpack.c.bf16 %v468_v19, %v468_v19  ;;  %v720_v21 = vpop.f32.mrb[5].mxu0  ;;  %s1148_s13 = scalar_lea.hbm %s1209_s6, %s1070_s19  ;;  %s1219_s30 = scalar_lea.vmem [#allocation6], %s1063_s17 }
 0x11e   : > { %v471_v22 = vpop.f32.mrb[6].mxu0  ;;  %s851_s24 = scalar_lea.vmem %s1151_s27, 64  ;;  %s939_s11 = smov [#allocation6]  }
 0x11f   : > { %475 = vst.msk [vmem:[%s1219_s30] sm:$0xf] %vm358_vm2, %v474_v20  ;;  %v721_v23 = vpop.f32.mrb[7].mxu0  ;;  %p852_p7 = scmp.ne.s32.totalorder %s1151_s27, %s851_s24  ;;  %s855_s15 = sshll.u32 %s939_s11, 4  ;;  %s856_s15 = int_to_ptr.vmem [resolvable:$false] %s855_s15 }
 0x120   : > { %s857_s19 = scalar_lea.vmem %s856_s15, 128  ;;  %p858_p11 = scmp.lt.s32.totalorder %s1151_s27, %s856_s15 }
 0x121   : > { %p853_p9 = pnand %p852_p7, %p1017_p4  ;;  %p859_p12 = scmp.lt.s32.totalorder %s857_s19, %s851_s24 }
 0x123   : > { %p854_p10 = pneg %p853_p9  ;;  %p860_p13 = por %p859_p12, %p858_p11 }
 0x125   : > { %p861_p0 = pnand %p860_p13, %p854_p10 }
 0x127   : > { %864 = shalt.err (!%p861_p0)
}
 0x128   : > { %s865_s17 = scalar_lea.hbm %s1148_s13, 64  ;;  %s869_s0 = scalar_lea.hbm %s1209_s6, 128 }
 0x129   : > { %p866_p1 = scmp.ne.s32.totalorder %s1148_s13, %s865_s17  ;;  %p870_p5 = scmp.lt.u32.totalorder %s1148_s13, %s1209_s6 }
 0x12a   : > { %p871_p6 = scmp.lt.u32.totalorder %s869_s0, %s865_s17  ;;  %p873_p9 = scmp.lt.u32.totalorder %s865_s17, %s1148_s13 }
 0x12b   : > { %p867_p2 = pnand %p866_p1, %p1017_p4 }
 0x12c   : > { %p872_p7 = por %p871_p6, %p870_p5 }
 0x12d   : > { %p868_p3 = pneg %p867_p2 }
 0x12e   : > { %p874_p10 = por %p873_p9, %p872_p7 }
 0x130   : > { %p875_p11 = pnand %p874_p10, %p868_p3 }
 0x132   : > { %878 = shalt.err (!%p875_p11)
}
 0x133   : > { %s1220_s12 = scalar_lea.sflag [#allocation5], %s1067_s18 }
 0x134   : > { %724 = dma.vmem_to_hbm [thread:$0]  (%p1017_p4), %s1151_s27, 64, %s1148_s13, %s1220_s12  }
 0x135 PF: > { %p738_p12 = scmp.ge.s32.totalorder %s933_s26, 2  ;;  %s541_s8 = sand.u32 1, %s913_s21  }
 0x136   : > { %s542_s30 = scalar_lea.sflag [#allocation3], %s541_s8 }
 0x137   : > { %p729_p13 = pnand %p738_p12, %p1026_p8 }
 0x139   : > { %904 = dma.done.wait (!%p729_p13), %s542_s30, 64  }
 0x13a   : > { %906 = vsyncadd (!%p729_p13), %s542_s30, 4294967232  ;;  %s1221_s24 = sadd.s32 4294967294, %s933_s26  }
 0x13b   : > { %s550_s11 = sand.u32 1, %s1221_s24  }
 0x13c   : > { %s551_s7 = scalar_lea.sflag [#allocation5], %s550_s11 }
 0x13d   : > { %908 = dma.done.wait (!%p729_p13), %s551_s7, 128  }
 0x13e   : > { %910 = vsyncadd (!%p729_p13), %s551_s7, 4294967168  ;;  %s23_s26 = sadd.s32 1, %s933_s26   ;;  %s1222_s21 = smov %s917_s22 }
 0x13f   : > { %p20_p4 = scmp.ge.s32.totalorder %s23_s26, 4   ;;  %s1223_s22 = smov %s921_s23 }
 0x140   : > { %s1224_s23 = smov %s1032_s10  ;;  %s1225_s24 = smov %s929_s25 }
 0x141   : > { %s1226_s25 = smov %s1228_s29  ;;  %22 = sbr.rel (!%p20_p4) target bundleno = 8 (0x8), region = 103 }
 0x148   :  { %565 = vsyncpa [#allocation3], 1 }
 0x149   :  { %567 = vsyncpa [#allocation3 + $0x1], 1 }
 0x14a   :  { %568 = vsyncpa [#allocation5], 1 }
 0x14b   :  { %570 = vsyncpa [#allocation5 + $0x1], 1 }

</bundles_post_ra>
